<compile_context>
chip_gen: v6e
topology: v6e:2x2x1
jax: 0.10.0
libtpu: 0.0.40
codegen_flags: <defaults>
</compile_context>

<pallas_src>
import jax
import jax.numpy as jnp
from jax import lax
from jax.experimental import pallas as pl
from jax.experimental.pallas import tpu as pltpu

_NEG_BIG = jnp.float32(-1e30)   # bias for padded classes -> exp underflows to 0


def _round_up(v, m):
    return ((v + m - 1) // m) * m


def _tile_loss(x_ref, w_ref, b_ref, tags_ref):
    """Summed CE loss for one token tile.  Row-wise math, so any garbage rows
    from a ragged boundary DMA are fully neutralized by their tag == -1."""
    # hidden2tag: cast f32 activations to bf16 right before the MXU;
    # bf16 x bf16 matmul with f32 accumulation.
    logits = jnp.dot(x_ref[...].astype(jnp.bfloat16), w_ref[...],
                     preferred_element_type=jnp.float32) + b_ref[...]

    tags = tags_ref[...]                                     # (tile_n, 1) int32

    # stable log-sum-exp over the lane-dense, padded class axis
    m = jnp.max(logits, axis=-1, keepdims=True)              # (tile_n, 1)
    lse = m + jnp.log(jnp.sum(jnp.exp(logits - m), axis=-1, keepdims=True))

    tn, c = logits.shape
    # gather logits at the target class via one-hot select (no per-row gather on TPU)
    class_ids = lax.broadcasted_iota(jnp.int32, (tn, c), 1)  # (tile_n, C_pad)
    onehot = class_ids == tags                               # broadcast (tile_n, 1)
    logit_at_tag = jnp.sum(jnp.where(onehot, logits, 0.0),
                           axis=-1, keepdims=True)           # (tile_n, 1)

    valid = tags != -1                                       # ignore_index = -1
    per_token = jnp.where(valid, lse - logit_at_tag, 0.0)    # (tile_n, 1)
    return jnp.sum(per_token)                                # f32 scalar


def _ce_loss_kernel_tiles(x_ref, w_ref, b_ref, tags_ref, o_ref):
    """Per-tile partial output (v7x: tiles shard across both TensorCores)."""
    partial = _tile_loss(x_ref, w_ref, b_ref, tags_ref)
    # Splat into a fully (8,128)-aligned lane-dense slab -> unmasked vst.
    o_ref[...] = jnp.zeros_like(o_ref) + partial


def _ce_loss_kernel_accum(x_ref, w_ref, b_ref, tags_ref, o_ref):
    """Resident-accumulator output (v5e/v6e: single TensorCore, grid is a loop)."""
    @pl.when(pl.program_id(0) == 0)
    def _():
        o_ref[...] = jnp.zeros_like(o_ref)
    o_ref[...] = o_ref[...] + _tile_loss(x_ref, w_ref, b_ref, tags_ref)


def _has_two_tensorcores():
    """v7x packs 2 TensorCores per chip; v5e/v6e have 1."""
    try:
        kind = jax.devices()[0].device_kind.lower()
    except Exception:
        return True
    return ("v7" in kind) or ("7x" in kind)


def decoder_linear_loss(x, tags, mask, weight, bias, *,
                        tile_n=512, per_tile_outputs=None,
                        vmem_limit_bytes=48 * 1024 * 1024):
    """x: (B, T, D) f32, tags/mask: (B, T) int, weight: (D, C), bias: (C,)."""
    B, T, D = x.shape
    C = weight.shape[1]
    N = B * T

    LANE = 128
    C_pad = _round_up(C, LANE)

    # Big tiles amortize the ~0.35 us/step pipeline overhead; clamp for tiny N.
    tile_n_eff = min(_round_up(tile_n, 8), _round_up(N, 8))
    n_tiles = pl.cdiv(N, tile_n_eff)
    N_tags = n_tiles * tile_n_eff

    if per_tile_outputs is None:
        per_tile_outputs = _has_two_tensorcores()

    # x is fed to the kernel as-is (f32, unpadded) -- no extra HBM pass.
    x2 = x.reshape(N, D)

    # Resident weight/bias: weight shipped bf16 (MXU-native), padded classes get
    # bias -1e30 so they never contribute to LSE and are never selected.
    w_pad = jnp.zeros((D, C_pad), jnp.bfloat16).at[:, :C].set(
        weight.astype(jnp.bfloat16))
    b_pad = jnp.full((1, C_pad), _NEG_BIG, jnp.float32).at[0, :C].set(
        bias.astype(jnp.float32))

    # Combine tags+mask into one masked-tag stream (ignore_index = -1); pad the
    # (cheap) int32 column so ragged-boundary rows of x are ignored.
    if mask is None:
        mt = tags.reshape(N).astype(jnp.int32)
    else:
        mt = jnp.where(mask.reshape(N) == 0, -1, tags.reshape(N)).astype(jnp.int32)
    mt_pad = jnp.full((N_tags, 1), -1, jnp.int32).at[:N, 0].set(mt)

    in_specs = [
        pl.BlockSpec((tile_n_eff, D), lambda i: (i, 0)),     # x token tile (f32)
        pl.BlockSpec((D, C_pad), lambda i: (0, 0)),          # weight (resident)
        pl.BlockSpec((1, C_pad), lambda i: (0, 0)),          # bias   (resident)
        pl.BlockSpec((tile_n_eff, 1), lambda i: (i, 0)),     # masked tags tile
    ]

    if per_tile_outputs:
        # v7x: independent per-tile partials -> both TensorCores run tiles.
        out_shape = jax.ShapeDtypeStruct((n_tiles, 8, 128), jnp.float32)
        out_specs = pl.BlockSpec((1, 8, 128), lambda i: (i, 0, 0))
        kernel = _ce_loss_kernel_tiles
        semantics = ("parallel",)
    else:
        # v5e/v6e: single resident accumulator block, one writeback at the end.
        out_shape = jax.ShapeDtypeStruct((8, 128), jnp.float32)
        out_specs = pl.BlockSpec((8, 128), lambda i: (0, 0))
        kernel = _ce_loss_kernel_accum
        semantics = ("arbitrary",)

    out = pl.pallas_call(
        kernel,
        out_shape=out_shape,
        grid_spec=pltpu.PrefetchScalarGridSpec(
            num_scalar_prefetch=0,
            grid=(n_tiles,),
            in_specs=in_specs,
            out_specs=out_specs,
        ),
        compiler_params=pltpu.CompilerParams(
            dimension_semantics=semantics,
            vmem_limit_bytes=vmem_limit_bytes,
        ),
    )(x2, w_pad, b_pad, mt_pad)

    if per_tile_outputs:
        return jnp.sum(out[:, 0, 0])
    return out[0, 0]


def _reference_loss(x, tags, mask, weight, bias):
    """Pure-JAX reference of DecoderLinear.forward (dropout p=0), using the same
    bf16-rounded activations/weights the kernel uses (accumulation in f32)."""
    xb = x.astype(jnp.bfloat16).astype(jnp.float32)
    wb = weight.astype(jnp.bfloat16).astype(jnp.float32)
    feats = jnp.einsum("btd,dc->btc", xb, wb) + bias               # (B, T, C)
    masked_tags = jnp.where(mask == 0, -1, tags)                   # (B, T)
    logits = feats.reshape(-1, feats.shape[-1])
    t = masked_tags.reshape(-1)
    lse = jax.nn.logsumexp(logits, axis=-1)
    safe_t = jnp.where(t == -1, 0, t)
    picked = jnp.take_along_axis(logits, safe_t[:, None], axis=-1)[:, 0]
    per_tok = jnp.where(t == -1, 0.0, lse - picked)
    return jnp.sum(per_tok)


def _make_case(key, B, T, D, C):
    kx, kw, kb, kt, km = jax.random.split(key, 5)
    bound = 1.0 / jnp.sqrt(jnp.float32(D))
    weight = jax.random.uniform(kw, (D, C), jnp.float32, -bound, bound)
    bias = jax.random.uniform(kb, (C,), jnp.float32, -bound, bound)
    x = jax.random.normal(kx, (B, T, D), jnp.float32)
    tags = jax.random.randint(kt, (B, T), 0, C, jnp.int32)
    mask = (jax.random.uniform(km, (B, T)) > 0.2).astype(jnp.int32)
    return x, tags, mask, weight, bias


if __name__ == "__main__":
    key = jax.random.PRNGKey(0)
    k1, k2 = jax.random.split(key)

    # Case 1: small shapes consistent with the module (single tile).
    B, T, D = 2, 8, 32
    tag_to_ix = {f"TAG_{i}": i for i in range(8)}   # tagset_size = 8
    C = len(tag_to_ix)
    case1 = _make_case(k1, B, T, D, C)

    # Case 2: multi-tile grid with a ragged last tile (N=760 -> 2 tiles of 512;
    # rows 760..1023 of the last tile are boundary garbage masked by tag=-1).
    case2 = _make_case(k2, 4, 190, 64, 16)

    for case in (case1, case2):
        x, tags, mask, weight, bias = case
        ref = _reference_loss(x, tags, mask, weight, bias)
        # Exercise both output layouts (1-TC accumulator and 2-TC per-tile).
        for per_tile in (False, True):
            loss = jax.block_until_ready(
                decoder_linear_loss(x, tags, mask, weight, bias,
                                    per_tile_outputs=per_tile))
            assert jnp.allclose(loss, ref, rtol=2e-3, atol=2e-3), \
                (per_tile, loss, ref)

    # Auto (chip-detected) variant also runs clean.
    x, tags, mask, weight, bias = case1
    loss = jax.block_until_ready(decoder_linear_loss(x, tags, mask, weight, bias))
    ref = _reference_loss(x, tags, mask, weight, bias)
    assert jnp.allclose(loss, ref, rtol=2e-3, atol=2e-3), (loss, ref)

    print("KERNEL_OK")
</pallas_src>

<mosaic_0001>
module attributes {stable_mosaic.version = 11 : i64} {
  func.func @_ce_loss_kernel_accum(%arg0: i32, %arg1: memref<16x32xf32, #tpu.memory_space<vmem>>, %arg2: memref<32x128xbf16, #tpu.memory_space<vmem>>, %arg3: memref<1x128xf32, #tpu.memory_space<vmem>>, %arg4: memref<16x1xi32, #tpu.memory_space<vmem>>, %arg5: memref<8x128xf32, #tpu.memory_space<vmem>>) attributes {dimension_semantics = [#tpu.dimension_semantics<arbitrary>], iteration_bounds = array<i64: 1>, scalar_prefetch = 0 : i64, scratch_operands = 0 : i64, tpu.core_type = #tpu.core_type<tc>, window_params = [{transform_indices = @transform_0, window_bounds = array<i64: 16, 32>}, {pipeline_mode = #tpu.pipeline_mode<synchronous>, transform_indices = @transform_1, window_bounds = array<i64: 32, 128>}, {pipeline_mode = #tpu.pipeline_mode<synchronous>, transform_indices = @transform_2, window_bounds = array<i64: 1, 128>}, {transform_indices = @transform_3, window_bounds = array<i64: 16, 1>}, {pipeline_mode = #tpu.pipeline_mode<synchronous>, transform_indices = @transform_4, window_bounds = array<i64: 8, 128>}]} {
    %c0_i32 = arith.constant 0 : i32
    %0 = arith.cmpi eq, %arg0, %c0_i32 : i32
    %1 = arith.extui %0 : i1 to i32
    %c0_i32_0 = arith.constant 0 : i32
    %2 = arith.cmpi ne, %1, %c0_i32_0 : i32
    scf.if %2 {
      %cst_18 = arith.constant 0.000000e+00 : f32
      %40 = vector.broadcast %cst_18 : f32 to vector<8x128xf32>
      %c0_19 = arith.constant 0 : index
      %c0_20 = arith.constant 0 : index
      %41 = vector.load %arg5[%c0_19, %c0_20] : memref<8x128xf32, #tpu.memory_space<vmem>>, vector<8x128xf32>
      tpu.vector_store %arg5[%c0_19, %c0_20], %40 {strides = array<i32>} : memref<8x128xf32, #tpu.memory_space<vmem>>, vector<8x128xf32>,
    } else {
    }
    %c0 = arith.constant 0 : index
    %c0_1 = arith.constant 0 : index
    %3 = vector.load %arg5[%c0, %c0_1] : memref<8x128xf32, #tpu.memory_space<vmem>>, vector<8x128xf32>
    %c0_2 = arith.constant 0 : index
    %c0_3 = arith.constant 0 : index
    %4 = vector.load %arg1[%c0_2, %c0_3] : memref<16x32xf32, #tpu.memory_space<vmem>>, vector<16x32xf32>
    %5 = arith.truncf %4 : vector<16x32xf32> to vector<16x32xbf16>
    %c0_4 = arith.constant 0 : index
    %c0_5 = arith.constant 0 : index
    %6 = vector.load %arg2[%c0_4, %c0_5] : memref<32x128xbf16, #tpu.memory_space<vmem>>, vector<32x128xbf16>
    %cst = arith.constant dense<0.000000e+00> : vector<16x128xf32>
    %7 = tpu.matmul %5, %6, %cst {dimension_numbers = #tpu.dot_dimension_numbers<[1], [0], [0], [1], [0, 0, 1, 1], [], []>} : vector<16x32xbf16>, vector<32x128xbf16>, vector<16x128xf32> -> vector<16x128xf32>
    %c0_6 = arith.constant 0 : index
    %c0_7 = arith.constant 0 : index
    %8 = vector.load %arg3[%c0_6, %c0_7] : memref<1x128xf32, #tpu.memory_space<vmem>>, vector<1x128xf32>
    %9 = vector.broadcast %8 : vector<1x128xf32> to vector<16x128xf32>
    %10 = arith.addf %7, %9 : vector<16x128xf32>
    %c0_8 = arith.constant 0 : index
    %c0_9 = arith.constant 0 : index
    %11 = vector.load %arg4[%c0_8, %c0_9] : memref<16x1xi32, #tpu.memory_space<vmem>>, vector<16x1xi32>
    %cst_10 = arith.constant dense<0xFF800000> : vector<16xf32>
    %12 = vector.multi_reduction <maximumf>, %10, %cst_10 [1] : vector<16x128xf32> to vector<16xf32>
    %13 = vector.shape_cast %12 : vector<16xf32> to vector<16x1xf32>
    %14 = vector.broadcast %13 : vector<16x1xf32> to vector<16x128xf32>
    %15 = arith.subf %10, %14 : vector<16x128xf32>
    %16 = math.exp %15 : vector<16x128xf32>
    %cst_11 = arith.constant dense<0.000000e+00> : vector<16xf32>
    %17 = vector.multi_reduction <add>, %16, %cst_11 [1] : vector<16x128xf32> to vector<16xf32>
    %18 = vector.shape_cast %17 : vector<16xf32> to vector<16x1xf32>
    %19 = math.log %18 : vector<16x1xf32>
    %20 = arith.addf %13, %19 : vector<16x1xf32>
    %21 = tpu.iota {dimensions = array<i32: 1>} : vector<16x128xi32>
    %22 = vector.broadcast %11 : vector<16x1xi32> to vector<16x128xi32>
    %23 = arith.cmpi eq, %21, %22 : vector<16x128xi32>
    %cst_12 = arith.constant 0.000000e+00 : f32
    %24 = vector.broadcast %cst_12 : f32 to vector<16x128xf32>
    %25 = arith.select %23, %10, %24 : vector<16x128xi1>, vector<16x128xf32>
    %cst_13 = arith.constant dense<0.000000e+00> : vector<16xf32>
    %26 = vector.multi_reduction <add>, %25, %cst_13 [1] : vector<16x128xf32> to vector<16xf32>
    %27 = vector.shape_cast %26 : vector<16xf32> to vector<16x1xf32>
    %c-1_i32 = arith.constant -1 : i32
    %28 = vector.broadcast %c-1_i32 : i32 to vector<16x1xi32>
    %29 = arith.cmpi ne, %11, %28 : vector<16x1xi32>
    %30 = arith.subf %20, %27 : vector<16x1xf32>
    %cst_14 = arith.constant 0.000000e+00 : f32
    %31 = vector.broadcast %cst_14 : f32 to vector<16x1xf32>
    %32 = arith.select %29, %30, %31 : vector<16x1xi1>, vector<16x1xf32>
    %33 = vector.shape_cast %32 : vector<16x1xf32> to vector<1x16x1xf32>
    %cst_15 = arith.constant dense<0.000000e+00> : vector<1xf32>
    %34 = vector.multi_reduction <add>, %33, %cst_15 [1, 2] : vector<1x16x1xf32> to vector<1xf32>
    %35 = vector.shape_cast %34 : vector<1xf32> to vector<1x1x1xf32>
    %36 = vector.extract %35[0, 0, 0] : f32 from vector<1x1x1xf32>
    %37 = vector.broadcast %36 : f32 to vector<8x128xf32>
    %38 = arith.addf %3, %37 : vector<8x128xf32>
    %c0_16 = arith.constant 0 : index
    %c0_17 = arith.constant 0 : index
    %39 = vector.load %arg5[%c0_16, %c0_17] : memref<8x128xf32, #tpu.memory_space<vmem>>, vector<8x128xf32>
    tpu.vector_store %arg5[%c0_16, %c0_17], %38 {strides = array<i32>} : memref<8x128xf32, #tpu.memory_space<vmem>>, vector<8x128xf32>,
    return
  }
  func.func @transform_0(%arg0: i32) -> (i32, i32) {
    %c0_i32 = arith.constant 0 : i32
    %c0_i32_0 = arith.constant 0 : i32
    return %arg0, %c0_i32 : i32, i32
  }
  func.func @transform_1(%arg0: i32) -> (i32, i32) {
    %c0_i32 = arith.constant 0 : i32
    %c0_i32_0 = arith.constant 0 : i32
    %c0_i32_1 = arith.constant 0 : i32
    return %c0_i32, %c0_i32_0 : i32, i32
  }
  func.func @transform_2(%arg0: i32) -> (i32, i32) {
    %c0_i32 = arith.constant 0 : i32
    %c0_i32_0 = arith.constant 0 : i32
    %c0_i32_1 = arith.constant 0 : i32
    return %c0_i32, %c0_i32_0 : i32, i32
  }
  func.func @transform_3(%arg0: i32) -> (i32, i32) {
    %c0_i32 = arith.constant 0 : i32
    %c0_i32_0 = arith.constant 0 : i32
    return %arg0, %c0_i32 : i32, i32
  }
  func.func @transform_4(%arg0: i32) -> (i32, i32) {
    %c0_i32 = arith.constant 0 : i32
    %c0_i32_0 = arith.constant 0 : i32
    %c0_i32_1 = arith.constant 0 : i32
    return %c0_i32, %c0_i32_0 : i32, i32
  }
}

</mosaic_0001>

<bundles_post_ra>
// kernel: tpu_custom_call.1
= control target key start
LH: loop header
LB: loop body
LE: loop exit
PB: predicated region body
PF: predicated region fallthrough
CT: control target
= control target key end

     0   :  { %9 = vsyncpa [#allocation3], 0  ;;  %s318_s0 = inlined_call_operand.vmem [shape: f32[16,32], index: 0, kind: input, shape index: {}]   ;;  %s319_s1 = inlined_call_operand.hbm [shape: bf16[32,128], index: 1, kind: input, shape index: {}]   ;;  %s320_s2 = inlined_call_operand.vmem [shape: f32[1,128], index: 2, kind: input, shape index: {}]   ;;  %s321_s3 = inlined_call_operand.vmem [shape: s32[16,1], index: 3, kind: input, shape index: {}]   ;;  %s322_s4 = inlined_call_operand.hbm [shape: f32[8,128], index: 4, kind: output, shape index: {}]  }
   0x1   :  { %10 = vsyncpa [#allocation4], 0  ;;  %s265_s15 = smov [#allocation2]  }
   0x2   :  { %s18_s16 = sshll.u32 %s265_s15, 4  ;;  %s19_s16 = int_to_ptr.vmem [resolvable:$true] %s18_s16 }
   0x3   :  { %s229_s17 = scalar_lea.vmem %s19_s16, 256  ;;  %p234_p1 = scmp.lt.s32.totalorder %s19_s16, %s19_s16 }
   0x4   :  { %p230_p0 = scmp.ne.s32.totalorder %s19_s16, %s229_s17  ;;  %p235_p2 = scmp.lt.s32.totalorder %s229_s17, %s229_s17 }
   0x6   :  { %p236_p3 = por %p235_p2, %p234_p1 }
   0x8   :  { %p237_p4 = pnand %p236_p3, %p230_p0 }
   0xa   :  { %240 = shalt.err (!%p237_p4)
}
   0xb   :  { %s266_s18 = smov 64   ;;  %s267_s19 = smov 4  }
   0xc   :  { %24 = dma.hbm_to_vmem [thread:$0]  %s319_s1, 256, %s19_s16, [#allocation3], %s266_s18, %s266_s18, %s267_s19  }
   0xd   :  { %261 = dma.done.wait [#allocation3], 256  }
   0xe   :  { %262 = vsyncadd [#allocation3], 4294967040  ;;  %v268_v0 = vmov 0.0   ;;  %vm269_vm0 = vmmov 0   ;;  %v270_v1 = vmov 0   ;;  %v211_v2 = vld [vmem:[#allocation2 + $0x8] sm:$0xff]   ;;  %v132_v22 = vlaneseq }
   0xf   :  { %192 = vmatprep.subr.bf16.mxu0 %v268_v0  ;;  %196 = vmatprep.mubr.msk.bf16.mxu0 %vm269_vm0, %v268_v0  ;;  %v212_v3 = vld [vmem:[#allocation2] sm:$0xff]   ;;  %v40_v5 = vld [vmem:[%s318_s0 + $0x8] sm:$0xff]  ;;  %vm65_vm1 = vcmask 261120   ;;  %vm154_vm6 = vcmask 7168  }
  0x10   :  { %209 = vset.pattern.permute.xlu1 %v270_v1  ;;  %210 = vset.pattern.permute.xlu0 %v270_v1  ;;  %v39_v4 = vld [vmem:[%s318_s0] sm:$0xff]  ;;  %v111_v7 = vld [vmem:[%s321_s3 + $0x8] sm:$0xff]  ;;  %v133_v24 = vand.u32 127, %v132_v22  ;;  %s271_s0 = smov [#allocation5]  }
  0x11   :  { %193 = vmatpush3.bf16.msra.mxu0 %v211_v2  ;;  %v110_v6 = vld [vmem:[%s321_s3] sm:$0xff]  ;;  %v41_v8 = vpack.c.bf16 %v40_v5, %v39_v4  ;;  %vm149_vm5 = vcmp.ne.s32.totalorder %v111_v7, 4294967295 }
  0x12   :  { %194 = vmatprep.subr.bf16.mxu0 %v268_v0  ;;  %135 = vperm.xlu1 %209, %v110_v6   ;;  %v185_v9 = vld [vmem:[%s320_s2] ss:$0 sm:$0xff]  ;;  %vm148_vm4 = vcmp.ne.s32.totalorder %v110_v6, 4294967295  ;;  %s176_s2 = sshll.u32 %s271_s0, 4  ;;  %s177_s2 = int_to_ptr.vmem [resolvable:$true] %s176_s2 }
  0x13   :  { %s241_s5 = scalar_lea.vmem %s177_s2, 128  ;;  %p246_p6 = scmp.lt.s32.totalorder %s177_s2, %s177_s2 }
  0x14   :  { %p242_p5 = scmp.ne.s32.totalorder %s177_s2, %s241_s5  ;;  %p247_p7 = scmp.lt.s32.totalorder %s241_s5, %s241_s5 }
  0x15   :  { %195 = vmatpush3.bf16.msra.mxu0 %v212_v3 }
  0x16   :  { %138 = vperm.xlu1 %209, %v111_v7   ;;  %p248_p8 = por %p247_p7, %p246_p6 }
  0x18   :  { %197 = vmatmul.mubr.msk.bf16.vlgmr.msra.gmra.mxu0 %vm65_vm1, %v41_v8  ;;  %p249_p9 = pnand %p248_p8, %p242_p5 }
  0x8d   :  { %v136_v23 = vpop.permute.xlu1 %135 }
  0x8e   :  { %vm140_vm2 = vcmp.eq.s32.totalorder %v133_v24, %v136_v23 }
  0x91   :  { %v139_v26 = vpop.permute.xlu1 %138 }
  0x92   :  { %vm141_vm3 = vcmp.eq.s32.totalorder %v133_v24, %v139_v26 }
  0xd8   :  { %v103_v10 = vpop.f32.mrf.mxu0 }
  0xd9   :  { %v104_v11 = vadd.f32 %v185_v9, %v103_v10 }
  0xda   :  { %v198_v12 = vpop.f32.mrf.mxu0 }
  0xdb   :  { %112 = vmax.xlane.f32.xlu0 %v104_v11  ;;  %v142_v28 = vsel %vm140_vm2, %v104_v11, 0.0 }
  0xdc   :  { %v106_v13 = vpop.f32.mrf.mxu0 }
  0xdd   :  { %v107_v14 = vadd.f32 %v185_v9, %v106_v13 }
  0xde   :  { %v199_v15 = vpop.f32.mrf.mxu0 }
  0xdf   :  { %114 = vmax.xlane.f32.xlu0 %v107_v14  ;;  %v143_v29 = vsel %vm141_vm3, %v107_v14, 0.0 }
 0x164   :  { %v113_v16 = vpop.xlane.xlu0 %112 }
 0x165   :  { %v116_v17 = vsub.f32 %v104_v11, %v113_v16 }
 0x167   :  { %v118_v18 = vmul.f32 1.442695, %v116_v17 }
 0x168   :  { %v115_v19 = vpop.xlane.xlu0 %114 }
 0x169   :  { %213 = vpow2.f32 %v118_v18  ;;  %v117_v20 = vsub.f32 %v107_v14, %v115_v19 }
 0x16b   :  { %v120_v21 = vmul.f32 1.442695, %v117_v20 }
 0x16d   :  { %215 = vpow2.f32 %v120_v21 }
 0x176   :  { %v214_v25 = vpop.eup %213 }
 0x177   :  { %122 = vadd.xlane.f32.xlu0 %v214_v25 }
 0x17a   :  { %v216_v27 = vpop.eup %215 }
 0x17b   :  { %144 = vadd.xlane.f32.xlu0 %v142_v28  ;;  %124 = vadd.xlane.f32.xlu1 %v216_v27 }
 0x17f   :  { %146 = vadd.xlane.f32.xlu0 %v143_v29 }
 0x200   :  { %v123_v30 = vpop.xlane.xlu0 %122 }
 0x201   :  { %217 = vlog2.f32 %v123_v30 }
 0x204   :  { %v125_v31 = vpop.xlane.xlu1 %124  ;;  %v145_v34 = vpop.xlane.xlu0 %144 }
 0x205   :  { %219 = vlog2.f32 %v125_v31 }
 0x208   :  { %v147_v40 = vpop.xlane.xlu0 %146 }
 0x20e   :  { %v218_v32 = vpop.eup %217 }
 0x20f   :  { %v127_v33 = vmul.f32 0.6931472, %v218_v32 }
 0x211   :  { %v130_v35 = vadd.f32 %v127_v33, %v113_v16 }
 0x212   :  { %v220_v36 = vpop.eup %219 }
 0x213   :  { %v129_v37 = vmul.f32 0.6931472, %v220_v36  ;;  %v150_v38 = vsub.f32 %v130_v35, %v145_v34 }
 0x215   :  { %v131_v39 = vadd.f32 %v129_v37, %v115_v19  ;;  %v152_v41 = vsel %vm148_vm4, %v150_v38, 0.0 }
 0x216   :  { %v155_v44 = vsel %vm154_vm6, %v152_v41, 0.0 }
 0x217   :  { %v151_v42 = vsub.f32 %v131_v39, %v147_v40 }
 0x219   :  { %v153_v43 = vsel %vm149_vm5, %v151_v42, 0.0 }
 0x21a   :  { %v156_v45 = vsel %vm154_vm6, %v153_v43, 0.0 }
 0x21b   :  { %v157_v46 = vadd.f32 %v156_v45, %v155_v44 }
 0x21d   :  { %158 = vadd.xlane.f32.xlu0 %v157_v46 }
 0x2a6   :  { %v159_v47 = vpop.xlane.xlu0 %158 }
 0x2a7   :  { %v160_v48 = vrot.slane %v159_v47, 4 }
 0x2a9   :  { %v161_v49 = vadd.f32 %v160_v48, %v159_v47 }
 0x2ab   :  { %v162_v50 = vrot.slane %v161_v49, 2 }
 0x2ad   :  { %v163_v51 = vadd.f32 %v162_v50, %v161_v49 }
 0x2af   :  { %v164_v52 = vrot.slane %v163_v51, 1 }
 0x2b1   :  { %v165_v53 = vadd.f32 %v164_v52, %v163_v51 }
 0x2b3   :  { %200 = vpush %v165_v53 }
 0x2e4   :  { %s201_s3 = spop %200 }
 0x2e5   :  { %v167_v54 = vstv %s201_s3 }
 0x2e6   :  { %169 = vst [vmem:[#allocation5] sm:$0xff] %v167_v54 }
 0x2e7   :  { %252 = shalt.err (!%p249_p9)
}
 0x2e8   :  { %179 = dma.vmem_to_hbm [thread:$0]  %s177_s2, 128, %s322_s4, [#allocation4]  }
 0x2e9   :  { %263 = dma.done.wait [#allocation4], 128  }
 0x2ea   :  { %264 = vsyncadd [#allocation4], 4294967168 }
 0x2eb   :  { %183 = vsyncpa [#allocation3], 1 }
 0x2ec   :  { %184 = vsyncpa [#allocation4], 1 }

</bundles_post_ra>
